<compile_context>
chip_gen: v7x
topology: tpu7x:2x2x1
jax: 0.10.0
libtpu: 0.0.40
codegen_flags: <defaults>
</compile_context>

<pallas_src>
import functools

import numpy as np

import jax
import jax.numpy as jnp
from jax.experimental import pallas as pl
from jax.experimental.pallas import tpu as pltpu


def _round_up(x, m):
    return ((x + m - 1) // m) * m


_RESIDENT_VMEM_BUDGET = 32 * 1024 * 1024     # gate for the resident-weights path


# ---------------------- Primary kernel: resident weights ------------------- #

def _multiway_resident_kernel(eid_ref, split_ref, x_ref, w_ref, b_ref, o_ref):
    # eid_ref:   (s_tiles,) int32 SMEM — 0: expert A, 1: expert B, 2: boundary
    # split_ref: (1,)       int32 SMEM — split row along the S axis
    # x_ref:     (1, tm, K) block of the (G, S, K) activation view
    # w_ref:     (2, K, N)  bf16, fully resident in VMEM
    # b_ref:     (2, 1, N)  f32,  fully resident in VMEM
    # o_ref:     (1, tm, N)
    s = pl.program_id(1)
    eid = eid_ref[s]
    x = x_ref[0].astype(jnp.bfloat16)            # in-kernel cast: no HBM repack
    tm = x.shape[0]

    @pl.when(eid == 0)
    def _():
        y = jnp.dot(x, w_ref[0], preferred_element_type=jnp.float32) + b_ref[0]
        o_ref[0] = y.astype(o_ref.dtype)

    @pl.when(eid == 1)
    def _():
        y = jnp.dot(x, w_ref[1], preferred_element_type=jnp.float32) + b_ref[1]
        o_ref[0] = y.astype(o_ref.dtype)

    @pl.when(eid == 2)
    def _():
        # The single tile straddling split_position: compute both experts and
        # select per row (at most one such tile per S axis -> negligible cost).
        ya = jnp.dot(x, w_ref[0], preferred_element_type=jnp.float32) + b_ref[0]
        yb = jnp.dot(x, w_ref[1], preferred_element_type=jnp.float32) + b_ref[1]
        row = jax.lax.broadcasted_iota(jnp.int32, (tm, 1), 0) + s * tm
        o_ref[0] = jnp.where(row < split_ref[0], ya, yb).astype(o_ref.dtype)


def _multiway_resident_3d(x3, w_stack, b_stack, split_row):
    """x3: (G, S, K), rows with s < split_row -> expert A, else B."""
    G, S, K = x3.shape
    N = w_stack.shape[-1]
    out_dtype = x3.dtype

    tm = S if S <= 256 else 256                  # >=256 rows feeds the 256-wide MXU
    s_tiles = (S + tm - 1) // tm

    # Per S-tile expert id (static, computed at trace time).
    starts = np.arange(s_tiles, dtype=np.int64) * tm
    ends = np.minimum(starts + tm, S)
    eid_np = np.where(ends <= split_row, 0,
                      np.where(starts >= split_row, 1, 2)).astype(np.int32)
    eid = jnp.asarray(eid_np)
    split_arr = jnp.asarray([split_row], dtype=jnp.int32)

    # VMEM sizing (weights + biases resident, double-buffered x/out tiles).
    est = (2 * K * N * 2 + 2 * N * 4
           + 2 * tm * K * x3.dtype.itemsize
           + 2 * tm * N * jnp.dtype(out_dtype).itemsize)
    vlim = None
    if est > 12 * 1024 * 1024:
        vlim = int(min(56 * 1024 * 1024, max(32 * 1024 * 1024, int(est * 1.5))))

    return pl.pallas_call(
        _multiway_resident_kernel,
        out_shape=jax.ShapeDtypeStruct((G, S, N), out_dtype),
        grid_spec=pltpu.PrefetchScalarGridSpec(
            num_scalar_prefetch=2,
            grid=(G, s_tiles),
            in_specs=[
                # Activations: one (tm, K) row tile per grid step, full K.
                pl.BlockSpec((1, tm, K), lambda g, s, eid, sp: (g, s, 0)),
                # Both experts' weights / biases: fully VMEM-resident, no
                # per-tile re-streaming.
                pl.BlockSpec(memory_space=pltpu.MemorySpace.VMEM),
                pl.BlockSpec(memory_space=pltpu.MemorySpace.VMEM),
            ],
            out_specs=pl.BlockSpec((1, tm, N), lambda g, s, eid, sp: (g, s, 0)),
        ),
        compiler_params=pltpu.CompilerParams(
            dimension_semantics=("parallel", "parallel"),
            vmem_limit_bytes=vlim),
    )(eid, split_arr, x3, w_stack, b_stack)


# ------------------- Fallback kernel: streamed K/N tiling ------------------ #

def _multiway_streaming_kernel(eid_ref, x_ref, w_ref, b_ref, o_ref, acc_ref):
    # eid_ref routes the weight/bias index_maps per M tile (scalar prefetch).
    k = pl.program_id(2)

    @pl.when(k == 0)
    def _():
        acc_ref[...] = jnp.zeros_like(acc_ref)

    acc_ref[...] += jnp.dot(x_ref[...], w_ref[0],
                            preferred_element_type=jnp.float32)

    @pl.when(k == pl.num_programs(2) - 1)
    def _():
        o_ref[...] = (acc_ref[...] + b_ref[0]).astype(o_ref.dtype)


def _multiway_linear_streaming(x2d, w_stack, b_stack, *, row_split,
                               tm=256, tn=512, tk=512):
    """y[m] = x2d[m] @ W[e(m)] + b[e(m)], e(m)=0 for m<row_split else 1."""
    M, K = x2d.shape
    _, _, N = w_stack.shape
    out_dtype = x2d.dtype
    if M == 0:
        return jnp.zeros((0, N), out_dtype)

    tk = min(tk, _round_up(K, 128))
    tn = min(tn, _round_up(N, 128))
    k_pad = _round_up(K, tk)
    n_pad = _round_up(N, tn)

    # Segment-pad M so every tm-row tile is single-expert.
    m_a = row_split
    m_b = M - row_split
    m_a_pad = _round_up(m_a, tm) if m_a > 0 else 0
    m_b_pad = _round_up(m_b, tm) if m_b > 0 else 0
    m_pad = m_a_pad + m_b_pad

    x_bf = x2d.astype(jnp.bfloat16)
    segs = []
    if m_a_pad:
        segs.append(jnp.pad(x_bf[:m_a], ((0, m_a_pad - m_a), (0, k_pad - K))))
    if m_b_pad:
        segs.append(jnp.pad(x_bf[m_a:], ((0, m_b_pad - m_b), (0, k_pad - K))))
    x_p = segs[0] if len(segs) == 1 else jnp.concatenate(segs, axis=0)

    expert_ids = jnp.array([0] * (m_a_pad // tm) + [1] * (m_b_pad // tm),
                           dtype=jnp.int32)

    w_p = jnp.pad(w_stack.astype(jnp.bfloat16),
                  ((0, 0), (0, k_pad - K), (0, n_pad - N)))
    b_p = jnp.pad(b_stack.astype(jnp.float32),
                  ((0, 0), (0, 0), (0, n_pad - N)))

    grid = (m_pad // tm, n_pad // tn, k_pad // tk)

    y_p = pl.pallas_call(
        _multiway_streaming_kernel,
        out_shape=jax.ShapeDtypeStruct((m_pad, n_pad), out_dtype),
        grid_spec=pltpu.PrefetchScalarGridSpec(
            num_scalar_prefetch=1,
            grid=grid,
            in_specs=[
                pl.BlockSpec((tm, tk), lambda i, j, k, eid: (i, k)),
                pl.BlockSpec((1, tk, tn), lambda i, j, k, eid: (eid[i], k, j)),
                pl.BlockSpec((1, 1, tn), lambda i, j, k, eid: (eid[i], 0, j)),
            ],
            out_specs=pl.BlockSpec((tm, tn), lambda i, j, k, eid: (i, j)),
            scratch_shapes=[pltpu.VMEM((tm, tn), jnp.float32)],
        ),
        compiler_params=pltpu.CompilerParams(
            dimension_semantics=("parallel", "parallel", "arbitrary")),
    )(expert_ids, x_p, w_p, b_p)

    if m_a_pad and m_b_pad:
        y = jnp.concatenate([y_p[:m_a], y_p[m_a_pad:m_a_pad + m_b]], axis=0)
    elif m_a_pad:
        y = y_p[:m_a]
    else:
        y = y_p[:m_b]
    return y[:, :N]


def _multiway_streaming_3d(x3, w_stack, b_stack, split_row):
    G, S, K = x3.shape
    N = w_stack.shape[-1]
    if G == 1:
        y2d = _multiway_linear_streaming(x3[0], w_stack, b_stack,
                                         row_split=split_row)
        return y2d[None]
    # Make A-rows / B-rows contiguous in a flat (M, K) view.
    x2d = jnp.transpose(x3, (1, 0, 2)).reshape(S * G, K)
    y2d = _multiway_linear_streaming(x2d, w_stack, b_stack,
                                     row_split=split_row * G)
    return jnp.transpose(y2d.reshape(S, G, N), (1, 0, 2))


# --------------------------------- Dispatch -------------------------------- #

def _multiway_3d(x3, w_stack, b_stack, split_row, *, force_streaming=False):
    G, S, K = x3.shape
    N = w_stack.shape[-1]
    tm = S if S <= 256 else 256
    est = (2 * K * N * 2 + 2 * N * 4
           + 2 * tm * K * x3.dtype.itemsize
           + 2 * tm * N * x3.dtype.itemsize)
    if force_streaming or est > _RESIDENT_VMEM_BUDGET:
        return _multiway_streaming_3d(x3, w_stack, b_stack, split_row)
    return _multiway_resident_3d(x3, w_stack, b_stack, split_row)


# --------------------------- Multiway forward ------------------------------ #

@functools.partial(jax.jit,
                   static_argnames=("split_position", "dim", "force_streaming"))
def multiway_forward(x, w_stack, b_stack, *, split_position, dim=1,
                     force_streaming=False):
    """Mirrors MultiwayNetwork.forward (expert A = index 0, expert B = 1)."""
    ndim = x.ndim
    K = x.shape[-1]
    N = w_stack.shape[-1]
    d = dim % ndim
    if d == ndim - 1:
        raise ValueError("split axis must not be the feature axis")
    if x.size == 0:
        return jnp.zeros(x.shape[:-1] + (N,), x.dtype)

    if split_position in (-1, 0):
        # All rows through a single expert: flat (1, M, K) view, no repacking.
        x3 = x.reshape(1, -1, K)
        split_row = x3.shape[1] if split_position == -1 else 0
        y3 = _multiway_3d(x3, w_stack, b_stack, split_row,
                          force_streaming=force_streaming)
        return y3.reshape(*x.shape[:-1], N)

    if d == ndim - 2:
        # Canonical case: split axis adjacent to feature axis -> free reshape,
        # expert routed per S-tile inside the kernel (no moveaxis, no concat).
        G = 1
        for s_ in x.shape[:d]:
            G *= s_
        x3 = x.reshape(G, x.shape[d], K)
        y3 = _multiway_3d(x3, w_stack, b_stack, split_position,
                          force_streaming=force_streaming)
        return y3.reshape(*x.shape[:-1], N)

    # TODO(synk): split axes not adjacent to the feature axis still go through
    # one transpose; fold that layout walk into the index_map if it matters.
    x_t = jnp.moveaxis(x, d, ndim - 2)
    y_t = multiway_forward(x_t, w_stack, b_stack, split_position=split_position,
                           dim=ndim - 2, force_streaming=force_streaming)
    return jnp.moveaxis(y_t, ndim - 2, d)


# ------------------------------ Param prep --------------------------------- #

def _init_linear_params(key, in_features, out_features, dtype=jnp.float32):
    """Deterministic init mimicking nn.Linear.reset_parameters()."""
    kw, kb = jax.random.split(key)
    bound = 1.0 / jnp.sqrt(jnp.float32(in_features))
    # Stored as (in, out) so the kernel computes x @ W (== x @ W_pt.T).
    w = jax.random.uniform(kw, (in_features, out_features), dtype,
                           minval=-bound, maxval=bound)
    b = jax.random.uniform(kb, (1, out_features), dtype,
                           minval=-bound, maxval=bound)
    return w, b


def prepare_multiway_params(wa, ba, wb, bb):
    """Pre-cast / stack ONCE (keeps weight cast+pad out of the hot path)."""
    w_stack = jnp.stack([wa, wb], axis=0).astype(jnp.bfloat16)   # (2, K, N)
    b_stack = jnp.stack([ba, bb], axis=0).astype(jnp.float32)    # (2, 1, N)
    return w_stack, b_stack


# ---------------------------------- main ----------------------------------- #

if __name__ == "__main__":
    batch, seq, hidden = 2, 8, 32
    dim = 1  # multiway split axis (sequence)

    key = jax.random.PRNGKey(0)
    kx, ka, kb = jax.random.split(key, 3)

    x = jax.random.normal(kx, (batch, seq, hidden), jnp.float32)
    wa, ba = _init_linear_params(ka, hidden, hidden)   # module A
    wb, bb = _init_linear_params(kb, hidden, hidden)   # module B (reset copy)
    w_stack, b_stack = prepare_multiway_params(wa, ba, wb, bb)

    split_position = 3

    # Primary (resident-weights) kernel.
    y_all_a = multiway_forward(x, w_stack, b_stack, split_position=-1, dim=dim)
    y_all_b = multiway_forward(x, w_stack, b_stack, split_position=0, dim=dim)
    y_split = multiway_forward(x, w_stack, b_stack,
                               split_position=split_position, dim=dim)

    # Streaming fallback kernel (exercised explicitly at the same small shapes).
    y_split_s = multiway_forward(x, w_stack, b_stack,
                                 split_position=split_position, dim=dim,
                                 force_streaming=True)
    y_all_a_s = multiway_forward(x, w_stack, b_stack, split_position=-1,
                                 dim=dim, force_streaming=True)

    jax.block_until_ready((y_all_a, y_all_b, y_split, y_split_s, y_all_a_s))

    # Pure-JAX reference (same bf16-weight / f32-accumulate recipe).
    def ref_linear(xv, w_bf, b):
        return jnp.dot(xv.astype(jnp.bfloat16), w_bf,
                       preferred_element_type=jnp.float32) + b

    ref_a = ref_linear(x, w_stack[0], b_stack[0])
    ref_b = ref_linear(x, w_stack[1], b_stack[1])
    ref_split = jnp.concatenate(
        [ref_linear(x[:, :split_position], w_stack[0], b_stack[0]),
         ref_linear(x[:, split_position:], w_stack[1], b_stack[1])], axis=dim)

    assert y_all_a.shape == (batch, seq, hidden)
    assert y_split.shape == (batch, seq, hidden)
    assert jnp.allclose(y_all_a, ref_a, atol=1e-3, rtol=1e-3)
    assert jnp.allclose(y_all_b, ref_b, atol=1e-3, rtol=1e-3)
    assert jnp.allclose(y_split, ref_split, atol=1e-3, rtol=1e-3)
    assert jnp.allclose(y_split_s, ref_split, atol=1e-3, rtol=1e-3)
    assert jnp.allclose(y_all_a_s, ref_a, atol=1e-3, rtol=1e-3)

    print("KERNEL_OK")
</pallas_src>

<mosaic_0001>
module attributes {stable_mosaic.version = 11 : i64} {
  func.func @_multiway_resident_kernel(%arg0: i32, %arg1: i32, %arg2: memref<1xi32, #tpu.memory_space<smem>>, %arg3: memref<1xi32, #tpu.memory_space<smem>>, %arg4: memref<1x16x32xf32, #tpu.memory_space<vmem>>, %arg5: memref<2x32x32xbf16, #tpu.memory_space<vmem>>, %arg6: memref<2x1x32xf32, #tpu.memory_space<vmem>>, %arg7: memref<1x16x32xf32, #tpu.memory_space<vmem>>) attributes {dimension_semantics = [#tpu.dimension_semantics<parallel>, #tpu.dimension_semantics<parallel>], iteration_bounds = array<i64: 1, 1>, scalar_prefetch = 2 : i64, scratch_operands = 0 : i64, tpu.core_type = #tpu.core_type<tc>, window_params = [{transform_indices = @transform_0, window_bounds = array<i64: 1, 16, 32>}, {pipeline_mode = #tpu.pipeline_mode<synchronous>, transform_indices = @transform_1, window_bounds = array<i64: 2, 32, 32>}, {pipeline_mode = #tpu.pipeline_mode<synchronous>, transform_indices = @transform_2, window_bounds = array<i64: 2, 1, 32>}, {transform_indices = @transform_3, window_bounds = array<i64: 1, 16, 32>}]} {
    %0 = arith.index_cast %arg1 : i32 to index
    %1 = memref.load %arg2[%0] : memref<1xi32, #tpu.memory_space<smem>>
    %c0 = arith.constant 0 : index
    %c0_0 = arith.constant 0 : index
    %c0_1 = arith.constant 0 : index
    %2 = vector.load %arg4[%c0, %c0_0, %c0_1] : memref<1x16x32xf32, #tpu.memory_space<vmem>>, vector<1x16x32xf32>
    %3 = vector.shape_cast %2 : vector<1x16x32xf32> to vector<16x32xf32>
    %4 = arith.truncf %3 : vector<16x32xf32> to vector<16x32xbf16>
    %c0_i32 = arith.constant 0 : i32
    %5 = arith.cmpi eq, %1, %c0_i32 : i32
    %6 = arith.extui %5 : i1 to i32
    %c0_i32_2 = arith.constant 0 : i32
    %7 = arith.cmpi ne, %6, %c0_i32_2 : i32
    scf.if %7 {
      %c0_5 = arith.constant 0 : index
      %c0_6 = arith.constant 0 : index
      %c0_7 = arith.constant 0 : index
      %14 = vector.load %arg5[%c0_5, %c0_6, %c0_7] : memref<2x32x32xbf16, #tpu.memory_space<vmem>>, vector<1x32x32xbf16>
      %15 = vector.shape_cast %14 : vector<1x32x32xbf16> to vector<32x32xbf16>
      %cst = arith.constant dense<0.000000e+00> : vector<16x32xf32>
      %16 = tpu.matmul %4, %15, %cst {dimension_numbers = #tpu.dot_dimension_numbers<[1], [0], [0], [1], [0, 0, 1, 1], [], []>} : vector<16x32xbf16>, vector<32x32xbf16>, vector<16x32xf32> -> vector<16x32xf32>
      %c0_8 = arith.constant 0 : index
      %c0_9 = arith.constant 0 : index
      %c0_10 = arith.constant 0 : index
      %17 = vector.load %arg6[%c0_8, %c0_9, %c0_10] : memref<2x1x32xf32, #tpu.memory_space<vmem>>, vector<1x1x32xf32>
      %18 = vector.shape_cast %17 : vector<1x1x32xf32> to vector<1x32xf32>
      %19 = vector.broadcast %18 : vector<1x32xf32> to vector<16x32xf32>
      %20 = arith.addf %16, %19 : vector<16x32xf32>
      %c0_11 = arith.constant 0 : index
      %c0_12 = arith.constant 0 : index
      %c0_13 = arith.constant 0 : index
      %21 = vector.load %arg7[%c0_11, %c0_12, %c0_13] : memref<1x16x32xf32, #tpu.memory_space<vmem>>, vector<1x16x32xf32>
      %22 = vector.shape_cast %21 : vector<1x16x32xf32> to vector<16x32xf32>
      %23 = vector.shape_cast %20 : vector<16x32xf32> to vector<1x16x32xf32>
      tpu.vector_store %arg7[%c0_11, %c0_12, %c0_13], %23 {strides = array<i32>} : memref<1x16x32xf32, #tpu.memory_space<vmem>>, vector<1x16x32xf32>,
    } else {
    }
    %c1_i32 = arith.constant 1 : i32
    %8 = arith.cmpi eq, %1, %c1_i32 : i32
    %9 = arith.extui %8 : i1 to i32
    %c0_i32_3 = arith.constant 0 : i32
    %10 = arith.cmpi ne, %9, %c0_i32_3 : i32
    scf.if %10 {
      %c1 = arith.constant 1 : index
      %c0_5 = arith.constant 0 : index
      %c0_6 = arith.constant 0 : index
      %14 = vector.load %arg5[%c1, %c0_5, %c0_6] : memref<2x32x32xbf16, #tpu.memory_space<vmem>>, vector<1x32x32xbf16>
      %15 = vector.shape_cast %14 : vector<1x32x32xbf16> to vector<32x32xbf16>
      %cst = arith.constant dense<0.000000e+00> : vector<16x32xf32>
      %16 = tpu.matmul %4, %15, %cst {dimension_numbers = #tpu.dot_dimension_numbers<[1], [0], [0], [1], [0, 0, 1, 1], [], []>} : vector<16x32xbf16>, vector<32x32xbf16>, vector<16x32xf32> -> vector<16x32xf32>
      %c1_7 = arith.constant 1 : index
      %c0_8 = arith.constant 0 : index
      %c0_9 = arith.constant 0 : index
      %17 = vector.load %arg6[%c1_7, %c0_8, %c0_9] : memref<2x1x32xf32, #tpu.memory_space<vmem>>, vector<1x1x32xf32>
      %18 = vector.shape_cast %17 : vector<1x1x32xf32> to vector<1x32xf32>
      %19 = vector.broadcast %18 : vector<1x32xf32> to vector<16x32xf32>
      %20 = arith.addf %16, %19 : vector<16x32xf32>
      %c0_10 = arith.constant 0 : index
      %c0_11 = arith.constant 0 : index
      %c0_12 = arith.constant 0 : index
      %21 = vector.load %arg7[%c0_10, %c0_11, %c0_12] : memref<1x16x32xf32, #tpu.memory_space<vmem>>, vector<1x16x32xf32>
      %22 = vector.shape_cast %21 : vector<1x16x32xf32> to vector<16x32xf32>
      %23 = vector.shape_cast %20 : vector<16x32xf32> to vector<1x16x32xf32>
      tpu.vector_store %arg7[%c0_10, %c0_11, %c0_12], %23 {strides = array<i32>} : memref<1x16x32xf32, #tpu.memory_space<vmem>>, vector<1x16x32xf32>,
    } else {
    }
    %c2_i32 = arith.constant 2 : i32
    %11 = arith.cmpi eq, %1, %c2_i32 : i32
    %12 = arith.extui %11 : i1 to i32
    %c0_i32_4 = arith.constant 0 : i32
    %13 = arith.cmpi ne, %12, %c0_i32_4 : i32
    scf.if %13 {
      %c0_5 = arith.constant 0 : index
      %c0_6 = arith.constant 0 : index
      %c0_7 = arith.constant 0 : index
      %14 = vector.load %arg5[%c0_5, %c0_6, %c0_7] : memref<2x32x32xbf16, #tpu.memory_space<vmem>>, vector<1x32x32xbf16>
      %15 = vector.shape_cast %14 : vector<1x32x32xbf16> to vector<32x32xbf16>
      %cst = arith.constant dense<0.000000e+00> : vector<16x32xf32>
      %16 = tpu.matmul %4, %15, %cst {dimension_numbers = #tpu.dot_dimension_numbers<[1], [0], [0], [1], [0, 0, 1, 1], [], []>} : vector<16x32xbf16>, vector<32x32xbf16>, vector<16x32xf32> -> vector<16x32xf32>
      %c0_8 = arith.constant 0 : index
      %c0_9 = arith.constant 0 : index
      %c0_10 = arith.constant 0 : index
      %17 = vector.load %arg6[%c0_8, %c0_9, %c0_10] : memref<2x1x32xf32, #tpu.memory_space<vmem>>, vector<1x1x32xf32>
      %18 = vector.shape_cast %17 : vector<1x1x32xf32> to vector<1x32xf32>
      %19 = vector.broadcast %18 : vector<1x32xf32> to vector<16x32xf32>
      %20 = arith.addf %16, %19 : vector<16x32xf32>
      %c1 = arith.constant 1 : index
      %c0_11 = arith.constant 0 : index
      %c0_12 = arith.constant 0 : index
      %21 = vector.load %arg5[%c1, %c0_11, %c0_12] : memref<2x32x32xbf16, #tpu.memory_space<vmem>>, vector<1x32x32xbf16>
      %22 = vector.shape_cast %21 : vector<1x32x32xbf16> to vector<32x32xbf16>
      %cst_13 = arith.constant dense<0.000000e+00> : vector<16x32xf32>
      %23 = tpu.matmul %4, %22, %cst_13 {dimension_numbers = #tpu.dot_dimension_numbers<[1], [0], [0], [1], [0, 0, 1, 1], [], []>} : vector<16x32xbf16>, vector<32x32xbf16>, vector<16x32xf32> -> vector<16x32xf32>
      %c1_14 = arith.constant 1 : index
      %c0_15 = arith.constant 0 : index
      %c0_16 = arith.constant 0 : index
      %24 = vector.load %arg6[%c1_14, %c0_15, %c0_16] : memref<2x1x32xf32, #tpu.memory_space<vmem>>, vector<1x1x32xf32>
      %25 = vector.shape_cast %24 : vector<1x1x32xf32> to vector<1x32xf32>
      %26 = vector.broadcast %25 : vector<1x32xf32> to vector<16x32xf32>
      %27 = arith.addf %23, %26 : vector<16x32xf32>
      %28 = tpu.iota {dimensions = array<i32: 0>} : vector<16x1xi32>
      %c16_i32 = arith.constant 16 : i32
      %29 = arith.muli %arg1, %c16_i32 : i32
      %30 = vector.broadcast %29 : i32 to vector<16x1xi32>
      %31 = arith.addi %28, %30 : vector<16x1xi32>
      %c0_17 = arith.constant 0 : index
      %32 = memref.load %arg3[%c0_17] : memref<1xi32, #tpu.memory_space<smem>>
      %33 = vector.broadcast %32 : i32 to vector<16x1xi32>
      %34 = arith.cmpi slt, %31, %33 : vector<16x1xi32>
      %35 = vector.shape_cast %34 : vector<16x1xi1> to vector<16x1xi1>
      %36 = vector.broadcast %35 : vector<16x1xi1> to vector<16x32xi1>
      %37 = arith.select %36, %20, %27 : vector<16x32xi1>, vector<16x32xf32>
      %c0_18 = arith.constant 0 : index
      %c0_19 = arith.constant 0 : index
      %c0_20 = arith.constant 0 : index
      %38 = vector.load %arg7[%c0_18, %c0_19, %c0_20] : memref<1x16x32xf32, #tpu.memory_space<vmem>>, vector<1x16x32xf32>
      %39 = vector.shape_cast %38 : vector<1x16x32xf32> to vector<16x32xf32>
      %40 = vector.shape_cast %37 : vector<16x32xf32> to vector<1x16x32xf32>
      tpu.vector_store %arg7[%c0_18, %c0_19, %c0_20], %40 {strides = array<i32>} : memref<1x16x32xf32, #tpu.memory_space<vmem>>, vector<1x16x32xf32>,
    } else {
    }
    return
  }
  func.func @transform_0(%arg0: i32, %arg1: i32, %arg2: memref<1xi32, #tpu.memory_space<smem>>, %arg3: memref<1xi32, #tpu.memory_space<smem>>) -> (i32, i32, i32) {
    %c0_i32 = arith.constant 0 : i32
    %c0_i32_0 = arith.constant 0 : i32
    return %arg0, %arg1, %c0_i32 : i32, i32, i32
  }
  func.func @transform_1(%arg0: i32, %arg1: i32, %arg2: memref<1xi32, #tpu.memory_space<smem>>, %arg3: memref<1xi32, #tpu.memory_space<smem>>) -> (i32, i32, i32) {
    %c0_i32 = arith.constant 0 : i32
    %c0_i32_0 = arith.constant 0 : i32
    %c0_i32_1 = arith.constant 0 : i32
    %c0_i32_2 = arith.constant 0 : i32
    return %c0_i32, %c0_i32_0, %c0_i32_1 : i32, i32, i32
  }
  func.func @transform_2(%arg0: i32, %arg1: i32, %arg2: memref<1xi32, #tpu.memory_space<smem>>, %arg3: memref<1xi32, #tpu.memory_space<smem>>) -> (i32, i32, i32) {
    %c0_i32 = arith.constant 0 : i32
    %c0_i32_0 = arith.constant 0 : i32
    %c0_i32_1 = arith.constant 0 : i32
    %c0_i32_2 = arith.constant 0 : i32
    return %c0_i32, %c0_i32_0, %c0_i32_1 : i32, i32, i32
  }
  func.func @transform_3(%arg0: i32, %arg1: i32, %arg2: memref<1xi32, #tpu.memory_space<smem>>, %arg3: memref<1xi32, #tpu.memory_space<smem>>) -> (i32, i32, i32) {
    %c0_i32 = arith.constant 0 : i32
    %c0_i32_0 = arith.constant 0 : i32
    return %arg0, %arg1, %c0_i32 : i32, i32, i32
  }
}

</mosaic_0001>

<bundles_post_ra>
// kernel: multiway_forward.1
= control target key start
LH: loop header
LB: loop body
LE: loop exit
PB: predicated region body
PF: predicated region fallthrough
CT: control target
= control target key end

     0   :  { %s654_s0 = inlined_call_operand.<no memory space> [shape: s32[1], index: 0, kind: input, shape index: {}]   ;;  %s655_s1 = inlined_call_operand.<no memory space> [shape: s32[1], index: 1, kind: input, shape index: {}]   ;;  %s656_s2 = inlined_call_operand.hbm [shape: f32[1,16,32], index: 2, kind: input, shape index: {}]   ;;  %s657_s3 = inlined_call_operand.hbm [shape: bf16[2,32,32], index: 3, kind: input, shape index: {}]   ;;  %s658_s4 = inlined_call_operand.vmem [shape: f32[2,1,32], index: 4, kind: input, shape index: {}]   ;;  %s659_s5 = inlined_call_operand.hbm [shape: f32[1,16,32], index: 5, kind: output, shape index: {}]  }
   0x1   :  { %11 = sst [smem:[#allocation4]] %s655_s1 }
   0x2   :  { %12 = vsyncpa [#allocation6], 0 }
   0x3   :  { %13 = vsyncpa [#allocation9], 0 }
   0x4   :  { %14 = vsyncpa [#allocation7], 0  ;;  %s535_s20 = smov [#allocation5]   ;;  %s463_s24 = scalar_lea.hbm %s656_s2, 256 }
   0x5   :  { %s20_s21 = sshll.u32 %s535_s20, 4  ;;  %p464_p0 = scmp.ne.s32.totalorder %s656_s2, %s463_s24  ;;  %s21_s21 = int_to_ptr.vmem [resolvable:$true] %s20_s21 }
   0x6   :  { %p467_p1 = scmp.lt.u32.totalorder %s463_s24, %s656_s2 }
   0x8   :  { %p469_p2 = pnand %p467_p1, %p464_p0 }
   0xa   :  { %472 = shalt.err (!%p469_p2)
}
   0xb   :  { %s473_s1 = scalar_lea.vmem %s21_s21, 256  ;;  %p478_p4 = scmp.lt.s32.totalorder %s21_s21, %s21_s21 }
   0xc   :  { %p474_p3 = scmp.ne.s32.totalorder %s21_s21, %s473_s1  ;;  %p479_p5 = scmp.lt.s32.totalorder %s473_s1, %s473_s1 }
   0xe   :  { %p480_p6 = por %p479_p5, %p478_p4 }
  0x10   :  { %p481_p7 = pnand %p480_p6, %p474_p3 }
  0x12   :  { %484 = shalt.err (!%p481_p7)
}
  0x13   :  { %s536_s29 = smov 128   ;;  %s537_s30 = smov 8  }
  0x14   :  { %26 = dma.hbm_to_vmem [thread:$0]  %s656_s2, 256, %s21_s21, [#allocation6], %s536_s29, %s536_s29, %s537_s30  }
  0x15   :  { %s538_s8 = smov [#allocation8]   ;;  %s485_s12 = scalar_lea.hbm %s657_s3, 512 }
  0x16   :  { %s32_s9 = sshll.u32 %s538_s8, 4  ;;  %p486_p8 = scmp.ne.s32.totalorder %s657_s3, %s485_s12  ;;  %s33_s9 = int_to_ptr.vmem [resolvable:$true] %s32_s9 }
  0x17   :  { %p489_p9 = scmp.lt.u32.totalorder %s485_s12, %s657_s3 }
  0x19   :  { %p491_p10 = pnand %p489_p9, %p486_p8 }
  0x1b   :  { %494 = shalt.err (!%p491_p10)
}
  0x1c   :  { %s495_s17 = scalar_lea.vmem %s33_s9, 512  ;;  %p500_p12 = scmp.lt.s32.totalorder %s33_s9, %s33_s9 }
  0x1d   :  { %p496_p11 = scmp.ne.s32.totalorder %s33_s9, %s495_s17  ;;  %p501_p13 = scmp.lt.s32.totalorder %s495_s17, %s495_s17 }
  0x1f   :  { %p502_p0 = por %p501_p13, %p500_p12 }
  0x21   :  { %p503_p1 = pnand %p502_p0, %p496_p11 }
  0x23   :  { %506 = shalt.err (!%p503_p1)
}
  0x24   :  { %s539_s2 = smov 64   ;;  %s540_s18 = smov 4  }
  0x25   :  { %38 = dma.hbm_to_vmem [thread:$0]  %s657_s3, 512, %s33_s9, [#allocation9], %s539_s2, %s539_s2, %s540_s18  }
  0x26   :  { %529 = dma.done.wait [#allocation6], 256  }
  0x27   :  { %530 = vsyncadd [#allocation6], 4294967040 }
  0x28   :  { %531 = dma.done.wait [#allocation9], 512  }
  0x29   :  { %532 = vsyncadd [#allocation9], 4294966784  ;;  %v49_v0 = vld [vmem:[#allocation5] sm:$0xff]  ;;  %v50_v1 = vld [vmem:[#allocation5 + $0x8] sm:$0xff]  ;;  %p377_p2 = scmp.ne.s32.totalorder %s654_s0, 0 }
  0x2a   :  { %v608_v2 = vpack.c.bf16 %v50_v1, %v49_v0  ;;  %v455_v3 = vld [vmem:[#allocation8] sm:$0xff] (!%p377_p2)   ;;  %v541_v4 = vmov (!%p377_p2), 0.0   ;;  %v456_v5 = vld [vmem:[#allocation8 + $0x8] sm:$0xff] (!%p377_p2)   ;;  %vm542_vm0 = vmmov (!%p377_p2), 0   ;;  %vm79_vm1 = vcmask (!%p377_p2), 261120  }
  0x2b   :  { %55 = sbr.rel (%p377_p2) target bundleno = 268 (0x10c), region = 25  ;;  %410 = vmatprep.subr.bf16.mxu0 (!%p377_p2), %v541_v4  ;;  %414 = vmatprep.mubr.msk.bf16.mxu0 (!%p377_p2), %vm542_vm0, %v541_v4  ;;  %v378_v6 = vld [vmem:[%s658_s4] ss:$0 sm:$0xff] (!%p377_p2) }
  0x2c   :  { %411 = vmatpush3.bf16.msra.mxu0 (!%p377_p2), %v455_v3 }
  0x2d   :  { %412 = vmatprep.subr.bf16.mxu0 (!%p377_p2), %v541_v4 }
  0x30   :  { %413 = vmatpush3.bf16.msra.mxu0 (!%p377_p2), %v456_v5 }
  0x33   :  { %415 = vmatmul.mubr.msk.bf16.vlgmr.msra.gmra.mrb[0].mxu0 %vm79_vm1, %v608_v2 }
 0x106   :  { %v117_v7 = vpop.f32.mrb[0].mxu0 }
 0x107   :  { %v118_v8 = vadd.f32 %v378_v6, %v117_v7  ;;  %v416_v9 = vpop.f32.mrb[1].mxu0 }
 0x108   :  { %v120_v10 = vpop.f32.mrb[2].mxu0 }
 0x109   :  { %124 = vst.msk [vmem:[#allocation10] sm:$0xff] %vm79_vm1, %v118_v8  ;;  %v121_v11 = vadd.f32 %v378_v6, %v120_v10  ;;  %v417_v12 = vpop.f32.mrb[3].mxu0 }
 0x10b   :  { %125 = vst.msk [vmem:[#allocation10 + $0x8] sm:$0xff] %vm79_vm1, %v121_v11 }
 0x10c PF:  { %p382_p3 = scmp.ne.s32.totalorder %s654_s0, 1 }
 0x10d   :  { %v457_v13 = vld [vmem:[#allocation8 + $0x10] sm:$0xff] (!%p382_p3)   ;;  %v543_v14 = vmov (!%p382_p3), 0.0   ;;  %v458_v15 = vld [vmem:[#allocation8 + $0x18] sm:$0xff] (!%p382_p3)   ;;  %vm544_vm2 = vmmov (!%p382_p3), 0   ;;  %vm155_vm3 = vcmask (!%p382_p3), 261120  }
 0x10e   :  { %129 = sbr.rel (%p382_p3) target bundleno = 495 (0x1ef), region = 29  ;;  %418 = vmatprep.subr.bf16.mxu0 (!%p382_p3), %v543_v14  ;;  %422 = vmatprep.mubr.msk.bf16.mxu0 (!%p382_p3), %vm544_vm2, %v543_v14  ;;  %v384_v16 = vld [vmem:[%s658_s4 + $0x1] ss:$0 sm:$0xff] (!%p382_p3) }
 0x10f   :  { %419 = vmatpush3.bf16.msra.mxu0 (!%p382_p3), %v457_v13 }
 0x110   :  { %420 = vmatprep.subr.bf16.mxu0 (!%p382_p3), %v543_v14 }
 0x113   :  { %421 = vmatpush3.bf16.msra.mxu0 (!%p382_p3), %v458_v15 }
 0x116   :  { %423 = vmatmul.mubr.msk.bf16.vlgmr.msra.gmra.mrb[0].mxu0 %vm155_vm3, %v608_v2 }
 0x1e9   :  { %v193_v17 = vpop.f32.mrb[0].mxu0 }
 0x1ea   :  { %v194_v18 = vadd.f32 %v384_v16, %v193_v17  ;;  %v424_v19 = vpop.f32.mrb[1].mxu0 }
 0x1eb   :  { %v196_v20 = vpop.f32.mrb[2].mxu0 }
 0x1ec   :  { %200 = vst.msk [vmem:[#allocation10] sm:$0xff] %vm155_vm3, %v194_v18  ;;  %v197_v21 = vadd.f32 %v384_v16, %v196_v20  ;;  %v425_v22 = vpop.f32.mrb[3].mxu0 }
 0x1ee   :  { %201 = vst.msk [vmem:[#allocation10 + $0x8] sm:$0xff] %vm155_vm3, %v197_v21 }
 0x1ef PF:  { %p388_p4 = scmp.ne.s32.totalorder %s654_s0, 2 }
 0x1f0   :  { %v459_v23 = vld [vmem:[#allocation8] sm:$0xff] (!%p388_p4)   ;;  %v545_v24 = vmov (!%p388_p4), 0.0   ;;  %v460_v25 = vld [vmem:[#allocation8 + $0x10] sm:$0xff] (!%p388_p4)   ;;  %v461_v26 = vld [vmem:[#allocation8 + $0x8] sm:$0xff] (!%p388_p4)   ;;  %vm546_vm4 = vmmov (!%p388_p4), 0   ;;  %vm229_vm5 = vcmask (!%p388_p4), 261120   ;;  %v340_v28 = vlaneseq (!%p388_p4) }
 0x1f1   :  { %205 = sbr.rel (%p388_p4) target bundleno = 724 (0x2d4), region = 33  ;;  %426 = vmatprep.subr.bf16.mxu0 (!%p388_p4), %v545_v24  ;;  %434 = vmatprep.subr.bf16.mxu1 (!%p388_p4), %v545_v24  ;;  %v462_v27 = vld [vmem:[#allocation8 + $0x18] sm:$0xff] (!%p388_p4)   ;;  %s347_s0 = sld [smem:[#allocation4]] (!%p388_p4)  ;;  %v389_v30 = vld [vmem:[%s658_s4] ss:$0 sm:$0xff] (!%p388_p4) }
 0x1f2   :  { %427 = vmatpush3.bf16.msra.mxu0 (!%p388_p4), %v459_v23  ;;  %430 = vmatprep.mubr.msk.bf16.mxu0 (!%p388_p4), %vm546_vm4, %v545_v24  ;;  %v341_v29 = vshrl.u32 (!%p388_p4), %v340_v28, 7  ;;  %v394_v32 = vld [vmem:[%s658_s4 + $0x1] ss:$0 sm:$0xff] (!%p388_p4) }
 0x1f3   :  { %435 = vmatpush3.bf16.msra.mxu1 (!%p388_p4), %v460_v25  ;;  %428 = vmatprep.subr.bf16.mxu0 (!%p388_p4), %v545_v24 }
 0x1f4   :  { %436 = vmatprep.subr.bf16.mxu1 (!%p388_p4), %v545_v24  ;;  %438 = vmatprep.mubr.msk.bf16.mxu1 (!%p388_p4), %vm546_vm4, %v545_v24  ;;  %v342_v33 = vadd.s32 (!%p388_p4), 8, %v341_v29 }
 0x1f6   :  { %429 = vmatpush3.bf16.msra.mxu0 (!%p388_p4), %v461_v26 }
 0x1f7   :  { %437 = vmatpush3.bf16.msra.mxu1 (!%p388_p4), %v462_v27  ;;  %v348_v31 = vstv (!%p388_p4), %s347_s0 }
 0x1f8   :  { %vm349_vm6 = vcmp.lt.s32.totalorder %v341_v29, %v348_v31  ;;  %vm350_vm7 = vcmp.lt.s32.totalorder %v342_v33, %v348_v31 }
 0x1f9   :  { %431 = vmatmul.mubr.msk.bf16.vlgmr.msra.gmra.mrb[0].mxu0 %vm229_vm5, %v608_v2 }
 0x1fa   :  { %439 = vmatmul.mubr.msk.bf16.vlgmr.msra.gmra.mrb[0].mxu1 %vm229_vm5, %v608_v2 }
 0x2cc   :  { %v267_v34 = vpop.f32.mrb[0].mxu0 }
 0x2cd   :  { %v268_v35 = vadd.f32 %v389_v30, %v267_v34  ;;  %v333_v36 = vpop.f32.mrb[0].mxu1  ;;  %v432_v37 = vpop.f32.mrb[1].mxu0 }
 0x2ce   :  { %v334_v38 = vadd.f32 %v394_v32, %v333_v36  ;;  %v440_v39 = vpop.f32.mrb[1].mxu1  ;;  %v270_v40 = vpop.f32.mrb[2].mxu0 }
 0x2cf   :  { %v271_v41 = vadd.f32 %v389_v30, %v270_v40  ;;  %v336_v42 = vpop.f32.mrb[2].mxu1  ;;  %v433_v43 = vpop.f32.mrb[3].mxu0 }
 0x2d0   :  { %v355_v44 = vsel %vm349_vm6, %v268_v35, %v334_v38  ;;  %v337_v45 = vadd.f32 %v394_v32, %v336_v42  ;;  %v441_v46 = vpop.f32.mrb[3].mxu1 }
 0x2d1   :  { %357 = vst.msk [vmem:[#allocation10] sm:$0xff] %vm229_vm5, %v355_v44 }
 0x2d2   :  { %v356_v47 = vsel %vm350_vm7, %v271_v41, %v337_v45 }
 0x2d3   :  { %358 = vst.msk [vmem:[#allocation10 + $0x8] sm:$0xff] %vm229_vm5, %v356_v47 }
 0x2d4 PF:  { %s547_s4 = smov [#allocation10]  }
 0x2d5   :  { %s364_s10 = sshll.u32 %s547_s4, 4  ;;  %s365_s10 = int_to_ptr.vmem [resolvable:$true] %s364_s10 }
 0x2d6   :  { %s507_s11 = scalar_lea.vmem %s365_s10, 256  ;;  %p512_p6 = scmp.lt.s32.totalorder %s365_s10, %s365_s10 }
 0x2d7   :  { %p508_p5 = scmp.ne.s32.totalorder %s365_s10, %s507_s11  ;;  %p513_p7 = scmp.lt.s32.totalorder %s507_s11, %s507_s11 }
 0x2d9   :  { %p514_p8 = por %p513_p7, %p512_p6 }
 0x2db   :  { %p515_p9 = pnand %p514_p8, %p508_p5 }
 0x2dd   :  { %518 = shalt.err (!%p515_p9)
}
 0x2de   :  { %s519_s14 = scalar_lea.hbm %s659_s5, 256 }
 0x2df   :  { %p520_p10 = scmp.ne.s32.totalorder %s659_s5, %s519_s14  ;;  %p523_p11 = scmp.lt.u32.totalorder %s519_s14, %s659_s5 }
 0x2e1   :  { %p525_p12 = pnand %p523_p11, %p520_p10 }
 0x2e3   :  { %528 = shalt.err (!%p525_p12)
}
 0x2e4   :  { %370 = dma.vmem_to_hbm [thread:$0]  %s365_s10, 256, %s659_s5, [#allocation7], %s536_s29, %s536_s29, %s537_s30  }
 0x2e5   :  { %533 = dma.done.wait [#allocation7], 256  }
 0x2e6   :  { %534 = vsyncadd [#allocation7], 4294967040 }
 0x2e7   :  { %374 = vsyncpa [#allocation6], 1 }
 0x2e8   :  { %375 = vsyncpa [#allocation9], 1 }
 0x2e9   :  { %376 = vsyncpa [#allocation7], 1 }

</bundles_post_ra>
